<compile_context>
chip_gen: v7x
topology: tpu7x:2x2x1
jax: 0.10.0
libtpu: 0.0.40
codegen_flags: <defaults>
</compile_context>

<pallas_src>
import jax
import jax.numpy as jnp
from jax.experimental import pallas as pl
from jax.experimental.pallas import tpu as pltpu

NUM_STATES = 10 * 3   # 30
NUM_ACTIONS = 6
H1 = 50
H2 = 30
OUT_PAD = 128         # lane-dense padded output width
DEFAULT_TB = 256      # batch tile for large batches (f32, well inside VMEM on v7x too)


def _round_up(n, m):
    return ((n + m - 1) // m) * m


def _net_kernel(x_ref, w1_ref, b1_ref, w2_ref, b2_ref, w3_ref, b3_ref, out_ref):
    # One batch tile per grid step.  Weights (bf16) feed the MXU, accumulation
    # and all elementwise work (bias add, ReLU) stay f32 on the VPU.
    x = x_ref[...]                                                     # (TB, 30) f32

    h1 = jnp.dot(x.astype(jnp.bfloat16), w1_ref[...],
                 preferred_element_type=jnp.float32)                   # (TB, 50)
    h1 = jnp.maximum(h1 + b1_ref[...], 0.0)

    h2 = jnp.dot(h1.astype(jnp.bfloat16), w2_ref[...],
                 preferred_element_type=jnp.float32)                   # (TB, 30)
    h2 = jnp.maximum(h2 + b2_ref[...], 0.0)

    out = jnp.dot(h2.astype(jnp.bfloat16), w3_ref[...],
                  preferred_element_type=jnp.float32)                  # (TB, 128)
    out_ref[...] = out + b3_ref[...]                                   # lane-dense store


def prepare_params(params):
    """Cast weights to bf16 and zero-pad the output layer to 128 lanes."""
    w1, b1, w2, b2, w3, b3 = params
    w3p = jnp.zeros((H2, OUT_PAD), jnp.float32).at[:, :NUM_ACTIONS].set(w3)
    b3p = jnp.zeros((1, OUT_PAD), jnp.float32).at[:, :NUM_ACTIONS].set(b3)
    return (w1.astype(jnp.bfloat16), b1,
            w2.astype(jnp.bfloat16), b2,
            w3p.astype(jnp.bfloat16), b3p)


def net_forward(x, prepared_params, *, tb=DEFAULT_TB):
    """x: (B, NUM_STATES) float32 -> (B, NUM_ACTIONS) float32."""
    w1, b1, w2, b2, w3p, b3p = prepared_params
    B = x.shape[0]

    # Pick the batch tile: full batch (rounded to 8 sublanes) for small B,
    # DEFAULT_TB otherwise; pad the batch to a whole number of tiles.
    TB = tb if B >= tb else _round_up(max(B, 8), 8)
    Bp = _round_up(B, TB)
    if Bp != B:
        x = jnp.pad(x, ((0, Bp - B), (0, 0)))
    n_tiles = Bp // TB

    const = lambda shape: pl.BlockSpec(shape, lambda i: tuple(0 for _ in shape))

    cost = pl.CostEstimate(
        flops=2 * Bp * (NUM_STATES * H1 + H1 * H2 + H2 * OUT_PAD),
        transcendentals=0,
        bytes_accessed=(Bp * NUM_STATES * 4 + Bp * OUT_PAD * 4
                        + (NUM_STATES * H1 + H1 * H2 + H2 * OUT_PAD) * 2
                        + (H1 + H2 + OUT_PAD) * 4),
    )

    out_padded = pl.pallas_call(
        _net_kernel,
        out_shape=jax.ShapeDtypeStruct((Bp, OUT_PAD), jnp.float32),
        grid=(n_tiles,),
        in_specs=[
            pl.BlockSpec((TB, NUM_STATES), lambda i: (i, 0)),   # x tile streams
            const((NUM_STATES, H1)),                            # weights stay resident
            const((1, H1)),
            const((H1, H2)),
            const((1, H2)),
            const((H2, OUT_PAD)),
            const((1, OUT_PAD)),
        ],
        out_specs=pl.BlockSpec((TB, OUT_PAD), lambda i: (i, 0)),
        compiler_params=pltpu.CompilerParams(
            dimension_semantics=("parallel",)),                 # megacore on v7x
        cost_estimate=cost,
    )(x, w1, b1, w2, b2, w3p, b3p)

    return out_padded[:B, :NUM_ACTIONS]


def init_params(key):
    """Deterministic init mirroring the PyTorch module:
    weights ~ Normal(0, 0.1); biases use PyTorch's default
    Uniform(-1/sqrt(fan_in), 1/sqrt(fan_in))."""
    ks = jax.random.split(key, 6)

    def linear(kw, kb, fan_in, fan_out):
        w = 0.1 * jax.random.normal(kw, (fan_in, fan_out), dtype=jnp.float32)
        bound = 1.0 / jnp.sqrt(float(fan_in))
        b = jax.random.uniform(kb, (1, fan_out), dtype=jnp.float32,
                               minval=-bound, maxval=bound)
        return w, b

    w1, b1 = linear(ks[0], ks[1], NUM_STATES, H1)
    w2, b2 = linear(ks[2], ks[3], H1, H2)
    w3, b3 = linear(ks[4], ks[5], H2, NUM_ACTIONS)
    return (w1, b1, w2, b2, w3, b3)


if __name__ == "__main__":
    key = jax.random.PRNGKey(0)
    k_params, k_x = jax.random.split(key)

    params = init_params(k_params)
    prepared = prepare_params(params)

    B = 8  # small batch for the sanity run; kernel pipelines/tiles larger batches
    x = jax.random.normal(k_x, (B, NUM_STATES), dtype=jnp.float32)

    out = net_forward(x, prepared)
    out = jax.block_until_ready(out)

    # Sanity check against a pure-JAX f32 reference of the same forward pass.
    # bf16 weights on the MXU => loosened tolerance vs. the f32 reference.
    w1, b1, w2, b2, w3, b3 = params
    ref = jnp.maximum(x @ w1 + b1, 0.0)
    ref = jnp.maximum(ref @ w2 + b2, 0.0)
    ref = ref @ w3 + b3
    assert out.shape == (B, NUM_ACTIONS)
    assert jnp.allclose(out, ref, atol=5e-2, rtol=5e-2), (
        float(jnp.max(jnp.abs(out - ref))))

    print("KERNEL_OK")
</pallas_src>

<mosaic_0001>
module attributes {stable_mosaic.version = 11 : i64} {
  func.func @_net_kernel(%arg0: i32, %arg1: memref<8x30xf32, #tpu.memory_space<vmem>>, %arg2: memref<30x50xbf16, #tpu.memory_space<vmem>>, %arg3: memref<1x50xf32, #tpu.memory_space<vmem>>, %arg4: memref<50x30xbf16, #tpu.memory_space<vmem>>, %arg5: memref<1x30xf32, #tpu.memory_space<vmem>>, %arg6: memref<30x128xbf16, #tpu.memory_space<vmem>>, %arg7: memref<1x128xf32, #tpu.memory_space<vmem>>, %arg8: memref<8x128xf32, #tpu.memory_space<vmem>>) attributes {dimension_semantics = [#tpu.dimension_semantics<parallel>], iteration_bounds = array<i64: 1>, scalar_prefetch = 0 : i64, scratch_operands = 0 : i64, tpu.core_type = #tpu.core_type<tc>, window_params = [{transform_indices = @transform_0, window_bounds = array<i64: 8, 30>}, {pipeline_mode = #tpu.pipeline_mode<synchronous>, transform_indices = @transform_1, window_bounds = array<i64: 30, 50>}, {pipeline_mode = #tpu.pipeline_mode<synchronous>, transform_indices = @transform_2, window_bounds = array<i64: 1, 50>}, {pipeline_mode = #tpu.pipeline_mode<synchronous>, transform_indices = @transform_3, window_bounds = array<i64: 50, 30>}, {pipeline_mode = #tpu.pipeline_mode<synchronous>, transform_indices = @transform_4, window_bounds = array<i64: 1, 30>}, {pipeline_mode = #tpu.pipeline_mode<synchronous>, transform_indices = @transform_5, window_bounds = array<i64: 30, 128>}, {pipeline_mode = #tpu.pipeline_mode<synchronous>, transform_indices = @transform_6, window_bounds = array<i64: 1, 128>}, {transform_indices = @transform_7, window_bounds = array<i64: 8, 128>}]} {
    %c0 = arith.constant 0 : index
    %c0_0 = arith.constant 0 : index
    %0 = vector.load %arg1[%c0, %c0_0] : memref<8x30xf32, #tpu.memory_space<vmem>>, vector<8x30xf32>
    %1 = arith.truncf %0 : vector<8x30xf32> to vector<8x30xbf16>
    %c0_1 = arith.constant 0 : index
    %c0_2 = arith.constant 0 : index
    %2 = vector.load %arg2[%c0_1, %c0_2] : memref<30x50xbf16, #tpu.memory_space<vmem>>, vector<30x50xbf16>
    %cst = arith.constant dense<0.000000e+00> : vector<8x50xf32>
    %3 = tpu.matmul %1, %2, %cst {dimension_numbers = #tpu.dot_dimension_numbers<[1], [0], [0], [1], [0, 0, 1, 1], [], []>} : vector<8x30xbf16>, vector<30x50xbf16>, vector<8x50xf32> -> vector<8x50xf32>
    %c0_3 = arith.constant 0 : index
    %c0_4 = arith.constant 0 : index
    %4 = vector.load %arg3[%c0_3, %c0_4] : memref<1x50xf32, #tpu.memory_space<vmem>>, vector<1x50xf32>
    %5 = vector.broadcast %4 : vector<1x50xf32> to vector<8x50xf32>
    %6 = arith.addf %3, %5 : vector<8x50xf32>
    %cst_5 = arith.constant 0.000000e+00 : f32
    %7 = vector.broadcast %cst_5 : f32 to vector<8x50xf32>
    %8 = arith.maximumf %6, %7 : vector<8x50xf32>
    %9 = arith.truncf %8 : vector<8x50xf32> to vector<8x50xbf16>
    %c0_6 = arith.constant 0 : index
    %c0_7 = arith.constant 0 : index
    %10 = vector.load %arg4[%c0_6, %c0_7] : memref<50x30xbf16, #tpu.memory_space<vmem>>, vector<50x30xbf16>
    %cst_8 = arith.constant dense<0.000000e+00> : vector<8x30xf32>
    %11 = tpu.matmul %9, %10, %cst_8 {dimension_numbers = #tpu.dot_dimension_numbers<[1], [0], [0], [1], [0, 0, 1, 1], [], []>} : vector<8x50xbf16>, vector<50x30xbf16>, vector<8x30xf32> -> vector<8x30xf32>
    %c0_9 = arith.constant 0 : index
    %c0_10 = arith.constant 0 : index
    %12 = vector.load %arg5[%c0_9, %c0_10] : memref<1x30xf32, #tpu.memory_space<vmem>>, vector<1x30xf32>
    %13 = vector.broadcast %12 : vector<1x30xf32> to vector<8x30xf32>
    %14 = arith.addf %11, %13 : vector<8x30xf32>
    %cst_11 = arith.constant 0.000000e+00 : f32
    %15 = vector.broadcast %cst_11 : f32 to vector<8x30xf32>
    %16 = arith.maximumf %14, %15 : vector<8x30xf32>
    %17 = arith.truncf %16 : vector<8x30xf32> to vector<8x30xbf16>
    %c0_12 = arith.constant 0 : index
    %c0_13 = arith.constant 0 : index
    %18 = vector.load %arg6[%c0_12, %c0_13] : memref<30x128xbf16, #tpu.memory_space<vmem>>, vector<30x128xbf16>
    %cst_14 = arith.constant dense<0.000000e+00> : vector<8x128xf32>
    %19 = tpu.matmul %17, %18, %cst_14 {dimension_numbers = #tpu.dot_dimension_numbers<[1], [0], [0], [1], [0, 0, 1, 1], [], []>} : vector<8x30xbf16>, vector<30x128xbf16>, vector<8x128xf32> -> vector<8x128xf32>
    %c0_15 = arith.constant 0 : index
    %c0_16 = arith.constant 0 : index
    %20 = vector.load %arg7[%c0_15, %c0_16] : memref<1x128xf32, #tpu.memory_space<vmem>>, vector<1x128xf32>
    %21 = vector.broadcast %20 : vector<1x128xf32> to vector<8x128xf32>
    %22 = arith.addf %19, %21 : vector<8x128xf32>
    %c0_17 = arith.constant 0 : index
    %c0_18 = arith.constant 0 : index
    %23 = vector.load %arg8[%c0_17, %c0_18] : memref<8x128xf32, #tpu.memory_space<vmem>>, vector<8x128xf32>
    tpu.vector_store %arg8[%c0_17, %c0_18], %22 {strides = array<i32>} : memref<8x128xf32, #tpu.memory_space<vmem>>, vector<8x128xf32>,
    return
  }
  func.func @transform_0(%arg0: i32) -> (i32, i32) {
    %c0_i32 = arith.constant 0 : i32
    %c0_i32_0 = arith.constant 0 : i32
    return %arg0, %c0_i32 : i32, i32
  }
  func.func @transform_1(%arg0: i32) -> (i32, i32) {
    %c0_i32 = arith.constant 0 : i32
    %c0_i32_0 = arith.constant 0 : i32
    %c0_i32_1 = arith.constant 0 : i32
    return %c0_i32, %c0_i32_0 : i32, i32
  }
  func.func @transform_2(%arg0: i32) -> (i32, i32) {
    %c0_i32 = arith.constant 0 : i32
    %c0_i32_0 = arith.constant 0 : i32
    %c0_i32_1 = arith.constant 0 : i32
    return %c0_i32, %c0_i32_0 : i32, i32
  }
  func.func @transform_3(%arg0: i32) -> (i32, i32) {
    %c0_i32 = arith.constant 0 : i32
    %c0_i32_0 = arith.constant 0 : i32
    %c0_i32_1 = arith.constant 0 : i32
    return %c0_i32, %c0_i32_0 : i32, i32
  }
  func.func @transform_4(%arg0: i32) -> (i32, i32) {
    %c0_i32 = arith.constant 0 : i32
    %c0_i32_0 = arith.constant 0 : i32
    %c0_i32_1 = arith.constant 0 : i32
    return %c0_i32, %c0_i32_0 : i32, i32
  }
  func.func @transform_5(%arg0: i32) -> (i32, i32) {
    %c0_i32 = arith.constant 0 : i32
    %c0_i32_0 = arith.constant 0 : i32
    %c0_i32_1 = arith.constant 0 : i32
    return %c0_i32, %c0_i32_0 : i32, i32
  }
  func.func @transform_6(%arg0: i32) -> (i32, i32) {
    %c0_i32 = arith.constant 0 : i32
    %c0_i32_0 = arith.constant 0 : i32
    %c0_i32_1 = arith.constant 0 : i32
    return %c0_i32, %c0_i32_0 : i32, i32
  }
  func.func @transform_7(%arg0: i32) -> (i32, i32) {
    %c0_i32 = arith.constant 0 : i32
    %c0_i32_0 = arith.constant 0 : i32
    return %arg0, %c0_i32 : i32, i32
  }
}

</mosaic_0001>

<bundles_post_ra>
// kernel: tpu_custom_call.1
= control target key start
LH: loop header
LB: loop body
LE: loop exit
PB: predicated region body
PF: predicated region fallthrough
CT: control target
= control target key end

     0   :  { %v358_v1 = vmov 0.0   ;;  %vm56_vm0 = vcmask 1046528   ;;  %vm359_vm1 = vmmov 0   ;;  %vm52_vm2 = vcmask 244736   ;;  %s453_s0 = inlined_call_operand.vmem [shape: f32[8,30], index: 0, kind: input, shape index: {}]   ;;  %s454_s1 = inlined_call_operand.vmem [shape: bf16[30,50], index: 1, kind: input, shape index: {}]   ;;  %s455_s2 = inlined_call_operand.vmem [shape: f32[1,50], index: 2, kind: input, shape index: {}]   ;;  %s456_s3 = inlined_call_operand.vmem [shape: bf16[50,30], index: 3, kind: input, shape index: {}]   ;;  %s457_s4 = inlined_call_operand.vmem [shape: f32[1,30], index: 4, kind: input, shape index: {}]   ;;  %s458_s5 = inlined_call_operand.vmem [shape: bf16[30,128], index: 5, kind: input, shape index: {}]   ;;  %s459_s6 = inlined_call_operand.vmem [shape: f32[1,128], index: 6, kind: input, shape index: {}]   ;;  %s460_s7 = inlined_call_operand.hbm [shape: f32[8,128], index: 7, kind: output, shape index: {}]  }
   0x1   :  { %v326_v0 = vld [vmem:[%s454_s1] sm:$0xff]   ;;  %295 = vmatprep.subr.bf16.mxu0 %v358_v1  ;;  %v327_v2 = vld [vmem:[%s454_s1 + $0x8] sm:$0x7f]   ;;  %303 = vmatprep.subr.bf16.mxu1 %v358_v1 }
   0x2   :  { %296 = vmatpush3.bf16.msra.mxu0 %v326_v0  ;;  %v28_v3 = vld [vmem:[%s453_s0] sm:$0xff]  ;;  %v58_v4 = vsel %vm56_vm0, %v327_v2, 0  ;;  %299 = vmatprep.mubr.msk.bf16.mxu0 %vm359_vm1, %v358_v1  ;;  %v329_v6 = vld [vmem:[%s456_s3 + $0x8] sm:$0xff]  }
   0x3   :  { %297 = vmatprep.subr.bf16.mxu0 %v358_v1  ;;  %v328_v5 = vld [vmem:[%s456_s3] sm:$0xff]   ;;  %311 = vmatprep.mubr.msk.bf16.mxu1 %vm359_vm1, %v358_v1  ;;  %v29_v7 = vpack.c.bf16 %v28_v3, %v28_v3 }
   0x4   :  { %304 = vmatpush3.bf16.msra.mxu1 %v328_v5 }
   0x5   :  { %305 = vmatprep.subr.bf16.mxu1 %v358_v1 }
   0x6   :  { %298 = vmatpush3.bf16.msra.mxu0 %v58_v4 }
   0x7   :  { %315 = vmatprep.subr.bf16.mxu0 %v358_v1 }
   0x8   :  { %12 = vsyncpa [#allocation3], 0  ;;  %306 = vmatpush3.bf16.msra.mxu1 %v329_v6  ;;  %v330_v8 = vld [vmem:[%s456_s3 + $0x10] sm:$0xff]   ;;  %v331_v9 = vld [vmem:[%s456_s3 + $0x18] ss:$0 sps:$4 sm:$0x11]  }
   0x9   :  { %300 = vmatmul.mubr.msk.bf16.vlgmr.msra.gmra.mrb[0].mxu0 %vm52_vm2, %v29_v7  ;;  %307 = vmatprep.subr.bf16.mxu1 %v358_v1  ;;  %vm141_vm3 = vcmask 1040384   ;;  %v332_v11 = vld [vmem:[%s458_s5] sm:$0xff]   ;;  %vm137_vm4 = vcmask 408576   ;;  %v333_v20 = vld [vmem:[%s458_s5 + $0x8] sm:$0x7f]   ;;  %s360_s5 = smov [#allocation2]  }
   0xa   :  { %319 = vmatprep.mubr.msk.bf16.mxu0 %vm359_vm1, %v358_v1  ;;  %v143_v10 = vsel %vm141_vm3, %v331_v9, 0  ;;  %316 = vmatpush3.bf16.msra.mxu0 %v332_v11  ;;  %v270_v12 = vld [vmem:[%s455_s2] ss:$0 sm:$0xff]  ;;  %v213_v21 = vsel %vm56_vm0, %v333_v20, 0  ;;  %s262_s21 = sshll.u32 %s360_s5, 4  ;;  %s263_s21 = int_to_ptr.vmem [resolvable:$true] %s262_s21 }
   0xb   :  { %317 = vmatprep.subr.bf16.mxu0 %v358_v1  ;;  %v274_v22 = vld [vmem:[%s457_s4] ss:$0 sm:$0xff]  ;;  %s334_s4 = scalar_lea.vmem %s263_s21, 128  ;;  %p339_p1 = scmp.lt.s32.totalorder %s263_s21, %s263_s21 }
   0xc   :  { %308 = vmatpush3.bf16.msra.mxu1 %v330_v8  ;;  %v280_v30 = vld [vmem:[%s459_s6] ss:$0 sm:$0xff]  ;;  %p335_p0 = scmp.ne.s32.totalorder %s263_s21, %s334_s4  ;;  %p340_p2 = scmp.lt.s32.totalorder %s334_s4, %s334_s4 }
   0xd   :  { %309 = vmatprep.subr.bf16.mxu1 %v358_v1 }
   0xe   :  { %318 = vmatpush3.bf16.msra.mxu0 %v213_v21  ;;  %p341_p3 = por %p340_p2, %p339_p1 }
  0x10   :  { %310 = vmatpush3.bf16.msra.mxu1 %v143_v10  ;;  %p342_p4 = pnand %p341_p3, %p335_p0 }
  0xdc   :  { %v94_v13 = vpop.f32.mrb[0].mxu0 }
  0xdd   :  { %v95_v14 = vadd.f32 %v270_v12, %v94_v13  ;;  %v301_v15 = vpop.f32.mrb[1].mxu0 }
  0xde   :  { %v97_v16 = vpop.f32.mrb[2].mxu0 }
  0xdf   :  { %v100_v17 = vmax.f32 %v95_v14, 0.0  ;;  %v302_v18 = vpop.f32.mrb[3].mxu0 }
  0xe1   :  { %v101_v19 = vpack.c.bf16 %v100_v17, %v100_v17 }
  0xe3   :  { %312 = vmatmul.mubr.msk.bf16.vlgmr.msra.gmra.mrb[0].mxu1 %vm137_vm4, %v101_v19 }
 0x1b6   :  { %v179_v23 = vpop.f32.mrb[0].mxu1 }
 0x1b7   :  { %v180_v24 = vadd.f32 %v274_v22, %v179_v23  ;;  %v313_v25 = vpop.f32.mrb[1].mxu1 }
 0x1b8   :  { %v182_v26 = vpop.f32.mrb[2].mxu1 }
 0x1b9   :  { %v185_v27 = vmax.f32 %v180_v24, 0.0  ;;  %v314_v28 = vpop.f32.mrb[3].mxu1 }
 0x1bb   :  { %v186_v29 = vpack.c.bf16 %v185_v27, %v185_v27 }
 0x1bd   :  { %320 = vmatmul.mubr.msk.bf16.vlgmr.msra.gmra.mrb[4].mxu0 %vm52_vm2, %v186_v29 }
 0x290   :  { %v249_v31 = vpop.f32.mrb[4].mxu0 }
 0x291   :  { %v250_v32 = vadd.f32 %v280_v30, %v249_v31  ;;  %v321_v33 = vpop.f32.mrb[5].mxu0 }
 0x292   :  { %v252_v34 = vpop.f32.mrb[6].mxu0 }
 0x293   :  { %255 = vst [vmem:[#allocation2] sm:$0xff] %v250_v32  ;;  %v322_v35 = vpop.f32.mrb[7].mxu0 }
 0x294   :  { %345 = shalt.err (!%p342_p4)
}
 0x295   :  { %s346_s6 = scalar_lea.hbm %s460_s7, 128 }
 0x296   :  { %p347_p5 = scmp.ne.s32.totalorder %s460_s7, %s346_s6  ;;  %p350_p6 = scmp.lt.u32.totalorder %s346_s6, %s460_s7 }
 0x298   :  { %p352_p7 = pnand %p350_p6, %p347_p5 }
 0x29a   :  { %355 = shalt.err (!%p352_p7)
}
 0x29b   :  { %265 = dma.vmem_to_hbm [thread:$0]  %s263_s21, 128, %s460_s7, [#allocation3]  }
 0x29c   :  { %356 = dma.done.wait [#allocation3], 128  }
 0x29d   :  { %357 = vsyncadd [#allocation3], 4294967168 }
 0x29e   :  { %269 = vsyncpa [#allocation3], 1 }

</bundles_post_ra>
